<compile_context>
chip_gen: v5e
topology: v5e:2x2
jax: 0.10.0
libtpu: 0.0.40
codegen_flags: <defaults>
</compile_context>

<pallas_src>
import functools
import math

import jax
import jax.numpy as jnp
from jax import lax
from jax.experimental import pallas as pl
from jax.experimental.pallas import tpu as pltpu


def _conv1d_relu_kernel(x_ref, w_ref, b_ref, o_ref, *,
                        c_in, tile_l, taps, multi_l):
    """One grid step = one batch element x one L_out tile.

    x_ref: (1, S*C_in, M)    polyphase-packed, zero-padded input for this batch element
    w_ref: (C_out, K*C_in)   flattened weight, column index = k*C_in + c_in
    b_ref: (C_out, 1)
    o_ref: (1, C_out, tile_l)
    """
    x = x_ref[0]                                        # (S*C_in, M)

    if multi_l:
        base = pl.multiple_of(pl.program_id(1) * tile_l, tile_l)

    # Build the fused RHS (K*C_in, tile_l) from K unit-stride slices of the
    # polyphase input (row block = phase, lane offset = tap offset).
    parts = []
    for (phase, off) in taps:
        row0 = phase * c_in
        if multi_l:
            part = lax.dynamic_slice(x, (row0, off + base), (c_in, tile_l))
        else:
            part = x[row0:row0 + c_in, off:off + tile_l]
        parts.append(part)
    rhs = parts[0] if len(parts) == 1 else jnp.concatenate(parts, axis=0)

    # Single MXU contraction of depth K*C_in, f32 accumulation; f32 epilogue.
    acc = jnp.dot(w_ref[...], rhs, preferred_element_type=jnp.float32)
    acc = acc + b_ref[...]                              # (C_out, 1) broadcast
    o_ref[0] = jnp.maximum(acc, 0.0).astype(o_ref.dtype)


def conv1d_relu(x, weight, bias, *, stride=1, padding=0, dilation=1,
                compute_dtype=None):
    """x: (N, C_in, L); weight: (C_out, C_in, K); bias: (C_out,).

    compute_dtype: optional MXU operand dtype (e.g. jnp.bfloat16 on v6e/v7x);
    accumulation / bias / ReLU stay float32; output keeps x.dtype.
    """
    n, c_in, l = x.shape
    c_out, c_in_w, k = weight.shape
    assert c_in_w == c_in, "groups > 1 not supported"

    l_pad = l + 2 * padding
    l_out = (l_pad - dilation * (k - 1) - 1) // stride + 1
    assert l_out > 0

    # ---- wrapper-side layout plumbing (plain JAX, no compute) ---------------
    # Polyphase re-layout so stride>1 becomes unit-stride in-kernel slices:
    #   x_poly[n, p*C_in + ci, m] = x_pad[n, ci, m*stride + p]
    # Tap k (k*dilation = q_k*stride + r_k) reads rows [r_k*C_in, (r_k+1)*C_in)
    # at lane offset q_k, length l_out.
    m_len = -(-l_pad // stride)                          # ceil(l_pad / stride)
    extra = m_len * stride - l_pad
    x_pad = jnp.pad(x, ((0, 0), (0, 0), (padding, padding + extra)))
    x_poly = (x_pad.reshape(n, c_in, m_len, stride)
              .transpose(0, 3, 1, 2)
              .reshape(n, stride * c_in, m_len))

    # Flatten weight to (C_out, K*C_in): column = k*C_in + ci (matches RHS order).
    w_flat = weight.transpose(0, 2, 1).reshape(c_out, k * c_in)
    bias2d = bias.reshape(c_out, 1).astype(jnp.float32)

    if compute_dtype is not None:
        x_poly = x_poly.astype(compute_dtype)
        w_flat = w_flat.astype(compute_dtype)

    taps = tuple(((kk * dilation) % stride, (kk * dilation) // stride)
                 for kk in range(k))

    # L_out tiling: full extent when small, otherwise 128-multiple lane tiles.
    tile_l = l_out
    for cand in (512, 256, 128):
        if l_out > cand and l_out % cand == 0:
            tile_l = cand
            break
    n_l_tiles = l_out // tile_l
    multi_l = n_l_tiles > 1

    kernel = functools.partial(
        _conv1d_relu_kernel,
        c_in=c_in, tile_l=tile_l, taps=taps, multi_l=multi_l,
    )

    cost = pl.CostEstimate(
        flops=2 * n * c_out * c_in * k * l_out,
        transcendentals=0,
        bytes_accessed=(x_poly.size * x_poly.dtype.itemsize
                        + w_flat.size * w_flat.dtype.itemsize
                        + bias2d.size * 4
                        + n * c_out * l_out * x.dtype.itemsize),
    )

    return pl.pallas_call(
        kernel,
        out_shape=jax.ShapeDtypeStruct((n, c_out, l_out), x.dtype),
        grid_spec=pltpu.PrefetchScalarGridSpec(
            num_scalar_prefetch=0,
            grid=(n, n_l_tiles),
            in_specs=[
                # x block index ignores the (innermost) L-tile axis -> stays resident.
                pl.BlockSpec((1, stride * c_in, m_len), lambda b, lt: (b, 0, 0)),
                pl.BlockSpec((c_out, k * c_in), lambda b, lt: (0, 0)),
                pl.BlockSpec((c_out, 1), lambda b, lt: (0, 0)),
            ],
            out_specs=pl.BlockSpec((1, c_out, tile_l), lambda b, lt: (b, 0, lt)),
        ),
        compiler_params=pltpu.CompilerParams(
            dimension_semantics=("parallel", "parallel")),
        cost_estimate=cost,
    )(x_poly, w_flat, bias2d)


def init_params(key, in_channels, out_channels, kernel_size):
    """Deterministic xavier_uniform_ weight + zero bias (matches module __init__)."""
    fan_in = in_channels * kernel_size
    fan_out = out_channels * kernel_size
    bound = math.sqrt(6.0 / (fan_in + fan_out))
    w = jax.random.uniform(
        key, (out_channels, in_channels, kernel_size),
        minval=-bound, maxval=bound, dtype=jnp.float32)
    b = jnp.zeros((out_channels,), dtype=jnp.float32)
    return w, b


def _reference(x, weight, bias, *, stride, padding, dilation):
    c_out = weight.shape[0]
    y = lax.conv_general_dilated(
        x, weight,
        window_strides=(stride,),
        padding=[(padding, padding)],
        rhs_dilation=(dilation,),
        dimension_numbers=("NCH", "OIH", "NCH"),
    ) + bias.reshape(1, c_out, 1)
    return jnp.maximum(y, 0.0)


if __name__ == "__main__":
    # Small shapes consistent with Conv1d forward: x is (batch, in_channels, length).
    N, C_IN, C_OUT, L, K = 2, 4, 8, 16, 3

    key = jax.random.PRNGKey(0)
    kx, kw = jax.random.split(key)
    x = jax.random.normal(kx, (N, C_IN, L), dtype=jnp.float32)
    weight, bias = init_params(kw, C_IN, C_OUT, K)

    # Main config: stride=1, padding=1, dilation=1.
    y = conv1d_relu(x, weight, bias, stride=1, padding=1, dilation=1)
    y = jax.block_until_ready(y)
    y_ref = _reference(x, weight, bias, stride=1, padding=1, dilation=1)
    assert y.shape == y_ref.shape, (y.shape, y_ref.shape)
    assert jnp.allclose(y, y_ref, atol=1e-5, rtol=1e-5), "mismatch vs reference (stride=1)"

    # Strided config exercises the wrapper-side polyphase path (unit-stride in-kernel).
    y2 = conv1d_relu(x, weight, bias, stride=2, padding=1, dilation=1)
    y2 = jax.block_until_ready(y2)
    y2_ref = _reference(x, weight, bias, stride=2, padding=1, dilation=1)
    assert y2.shape == y2_ref.shape, (y2.shape, y2_ref.shape)
    assert jnp.allclose(y2, y2_ref, atol=1e-5, rtol=1e-5), "mismatch vs reference (stride=2)"

    print("KERNEL_OK")
</pallas_src>

<mosaic_0001>
module attributes {stable_mosaic.version = 11 : i64} {
  func.func @_conv1d_relu_kernel(%arg0: i32, %arg1: i32, %arg2: memref<1x4x18xf32, #tpu.memory_space<vmem>>, %arg3: memref<8x12xf32, #tpu.memory_space<vmem>>, %arg4: memref<8x1xf32, #tpu.memory_space<vmem>>, %arg5: memref<1x8x16xf32, #tpu.memory_space<vmem>>) attributes {dimension_semantics = [#tpu.dimension_semantics<parallel>, #tpu.dimension_semantics<parallel>], iteration_bounds = array<i64: 2, 1>, scalar_prefetch = 0 : i64, scratch_operands = 0 : i64, tpu.core_type = #tpu.core_type<tc>, window_params = [{transform_indices = @transform_0, window_bounds = array<i64: 1, 4, 18>}, {pipeline_mode = #tpu.pipeline_mode<synchronous>, transform_indices = @transform_1, window_bounds = array<i64: 8, 12>}, {pipeline_mode = #tpu.pipeline_mode<synchronous>, transform_indices = @transform_2, window_bounds = array<i64: 8, 1>}, {transform_indices = @transform_3, window_bounds = array<i64: 1, 8, 16>}]} {
    %c0 = arith.constant 0 : index
    %c0_0 = arith.constant 0 : index
    %c0_1 = arith.constant 0 : index
    %0 = vector.load %arg2[%c0, %c0_0, %c0_1] : memref<1x4x18xf32, #tpu.memory_space<vmem>>, vector<1x4x18xf32>
    %1 = vector.shape_cast %0 : vector<1x4x18xf32> to vector<4x18xf32>
    %2 = vector.extract_strided_slice %1 {offsets = [0, 0], sizes = [4, 16], strides = [1, 1]} : vector<4x18xf32> to vector<4x16xf32>
    %3 = vector.extract_strided_slice %1 {offsets = [0, 1], sizes = [4, 16], strides = [1, 1]} : vector<4x18xf32> to vector<4x16xf32>
    %4 = vector.extract_strided_slice %1 {offsets = [0, 2], sizes = [4, 16], strides = [1, 1]} : vector<4x18xf32> to vector<4x16xf32>
    %5 = tpu.concatenate %2, %3, %4 in 0 : vector<4x16xf32>, vector<4x16xf32>, vector<4x16xf32> -> vector<12x16xf32>
    %c0_2 = arith.constant 0 : index
    %c0_3 = arith.constant 0 : index
    %6 = vector.load %arg3[%c0_2, %c0_3] : memref<8x12xf32, #tpu.memory_space<vmem>>, vector<8x12xf32>
    %cst = arith.constant dense<0.000000e+00> : vector<8x16xf32>
    %7 = tpu.matmul %6, %5, %cst {dimension_numbers = #tpu.dot_dimension_numbers<[1], [0], [0], [1], [0, 0, 1, 1], [], []>} : vector<8x12xf32>, vector<12x16xf32>, vector<8x16xf32> -> vector<8x16xf32>
    %c0_4 = arith.constant 0 : index
    %c0_5 = arith.constant 0 : index
    %8 = vector.load %arg4[%c0_4, %c0_5] : memref<8x1xf32, #tpu.memory_space<vmem>>, vector<8x1xf32>
    %9 = vector.broadcast %8 : vector<8x1xf32> to vector<8x16xf32>
    %10 = arith.addf %7, %9 : vector<8x16xf32>
    %cst_6 = arith.constant 0.000000e+00 : f32
    %11 = vector.broadcast %cst_6 : f32 to vector<8x16xf32>
    %12 = arith.maximumf %10, %11 : vector<8x16xf32>
    %c0_7 = arith.constant 0 : index
    %c0_8 = arith.constant 0 : index
    %c0_9 = arith.constant 0 : index
    %13 = vector.load %arg5[%c0_7, %c0_8, %c0_9] : memref<1x8x16xf32, #tpu.memory_space<vmem>>, vector<1x8x16xf32>
    %14 = vector.shape_cast %13 : vector<1x8x16xf32> to vector<8x16xf32>
    %15 = vector.shape_cast %12 : vector<8x16xf32> to vector<1x8x16xf32>
    tpu.vector_store %arg5[%c0_7, %c0_8, %c0_9], %15 {strides = array<i32>} : memref<1x8x16xf32, #tpu.memory_space<vmem>>, vector<1x8x16xf32>,
    return
  }
  func.func @transform_0(%arg0: i32, %arg1: i32) -> (i32, i32, i32) {
    %c0_i32 = arith.constant 0 : i32
    %c0_i32_0 = arith.constant 0 : i32
    %c0_i32_1 = arith.constant 0 : i32
    return %arg0, %c0_i32, %c0_i32_0 : i32, i32, i32
  }
  func.func @transform_1(%arg0: i32, %arg1: i32) -> (i32, i32) {
    %c0_i32 = arith.constant 0 : i32
    %c0_i32_0 = arith.constant 0 : i32
    %c0_i32_1 = arith.constant 0 : i32
    return %c0_i32, %c0_i32_0 : i32, i32
  }
  func.func @transform_2(%arg0: i32, %arg1: i32) -> (i32, i32) {
    %c0_i32 = arith.constant 0 : i32
    %c0_i32_0 = arith.constant 0 : i32
    %c0_i32_1 = arith.constant 0 : i32
    return %c0_i32, %c0_i32_0 : i32, i32
  }
  func.func @transform_3(%arg0: i32, %arg1: i32) -> (i32, i32, i32) {
    %c0_i32 = arith.constant 0 : i32
    %c0_i32_0 = arith.constant 0 : i32
    return %arg0, %c0_i32, %arg1 : i32, i32, i32
  }
}

</mosaic_0001>

<bundles_post_ra>
// kernel: tpu_custom_call.1
= control target key start
LH: loop header
LB: loop body
LE: loop exit
PB: predicated region body
PF: predicated region fallthrough
CT: control target
= control target key end

     0   :  { %8 = vsyncpa [#allocation3], 0  ;;  %s665_s0 = inlined_call_operand.vmem [shape: f32[2,4,18], index: 0, kind: input, shape index: {}]   ;;  %s666_s1 = inlined_call_operand.hbm [shape: f32[8,12], index: 1, kind: input, shape index: {}]   ;;  %s667_s2 = inlined_call_operand.vmem [shape: f32[8,1], index: 2, kind: input, shape index: {}]   ;;  %s668_s3 = inlined_call_operand.hbm [shape: f32[2,8,16], index: 3, kind: output, shape index: {}]  }
   0x1   :  { %9 = vsyncpa [#allocation4], 0 }
   0x2   :  { %11 = vsyncpa [#allocation4 + $0x1], 0  ;;  %s562_s12 = smov 0   ;;  %s564_s13 = smov 0  }
   0x3   :  { %s566_s14 = smov 0   ;;  %s568_s15 = smov 0  }
   0x4   :  { %s570_s16 = smov 0   ;;  %s572_s17 = smov 0  }
   0x5 LB: > { %s338_s18 = sadd.s32 4294967295, %s536_s17   ;;  %s339_s19 = sadd.s32 4294967294, %s536_s17   ;;  %s536_s17 = sphi %s572_s17, %s17_s17   ;;  %s532_s16 = sphi %s570_s16, %s675_s16   ;;  %s528_s15 = sphi %s568_s15, %s674_s15   ;;  %s524_s14 = sphi %s566_s14, %s673_s14   ;;  %s520_s13 = sphi %s564_s13, %s672_s13   ;;  %s516_s12 = sphi %s562_s12, %s671_s12  }
   0x6   : > { %s29_s20 = sadd.s32 1, %s532_s16  ;;  %s106_s21 = sadd.s32 1, %s524_s14 }
   0x7   : > { %p31_p0 = scmp.ge.s32.totalorder %s29_s20, 2  ;;  %p116_p1 = scmp.ne.s32.totalorder %s524_s14, %s520_s13 }
   0x8   : > { %p117_p2 = scmp.eq.s32.totalorder %s338_s18, 1  ;;  %p122_p3 = scmp.ne.s32.totalorder %s520_s13, %s516_s12 }
   0x9   : > { %s677_s20 = smov (%p31_p0, %s29_s20), 0  ;;  %p123_p5 = scmp.eq.s32.totalorder %s339_s19, 1 }
   0xa   : > { %p602_p4 = por %p117_p2, %p116_p1  ;;  %s101_s23 = ssub.s32 %s532_s16, %s677_s20 }
   0xb   : > { %p340_p6 = scmp.ge.s32.totalorder %s536_s17, 1  ;;  %p104_p7 = scmp.eq.s32.totalorder %s101_s23, 0 }
   0xc   : > { %p609_p8 = por %p123_p5, %p122_p3  ;;  %p130_p9 = scmp.lt.s32.totalorder %s536_s17, 3 }
   0xd   : > { %s615_s25 = scalar_select %p104_p7, %s524_s14, %s106_s21  }
   0xe   : > { %p131_p10 = pnand %p340_p6, %p130_p9  ;;  %p367_p11 = scmp.eq.s32.totalorder %s338_s18, 0 }
   0xf   : > { %s142_s28 = sshll.u32 %s666_s1, 4  ;;  %s538_s29 = smov [#allocation2]   ;;  %s143_s28 = int_to_ptr.hbm [resolvable:$true] %s142_s28 }
  0x10   : > { %p359_p12 = pneg %p131_p10  ;;  %s144_s30 = sshll.u32 %s538_s29, 4  ;;  %s145_s30 = int_to_ptr.vmem [resolvable:$true] %s144_s30 }
  0x11   : > { %167 = sbr.rel (%p131_p10) target bundleno = 288 (0x120), region = 32 }
  0x12   : > { %p360_p13 = pnand %p367_p11, %p359_p12 }
  0x14   : > { %362 = dma.hbm_to_vmem [thread:$0]  (!%p360_p13), %s143_s28, 128, %s145_s30, [#allocation3]  }
  0x16   : > { %507 = dma.done.wait (%p367_p11), [#allocation3], 128  }
  0x17   : > { %509 = vsyncadd (%p367_p11), [#allocation3], 4294967168  ;;  %p191_p0 = scmp.lt.s32.totalorder %s528_s15, 1  ;;  %s539_s9 = smov 126   ;;  %v206_v2 = vld [vmem:[%s667_s2] sm:$0xff]  ;;  %v541_v3 = vmov 0  }
  0x18   : > { %s540_s10 = smov 127   ;;  %422 = vset.pattern.permute.xlu1 %v541_v3  ;;  %423 = vset.pattern.permute.xlu0 %v541_v3  ;;  %vm203_vm0 = vcmask 1043456   ;;  %v205_v6 = vld [vmem:[#allocation2] sm:$0xff]  ;;  %vm212_vm1 = vcmask 97280   ;;  %s188_s19 = sand.u32 1, %s520_s13   ;;  %vm239_vm2 = vcmask 130048  }
  0x19   : > { %s192_s4 = scalar_select %p191_p0, %s528_s15, 1  ;;  %209 = vperm.xlu1 %422, %v206_v2  }
  0x1a   : > { %s345_s21 = sshll.u32 %s188_s19, 3  ;;  %s350_s23 = sshll.u32 %s528_s15, 3 }
  0x1b   : > { %s346_s5 = sshll.u32 %s192_s4, 2  ;;  %s253_s28 = scalar_lea.hbm %s668_s3, %s350_s23 }
  0x1c   : > { %s194_s8 = scalar_lea.vmem %s665_s0, %s346_s5  ;;  %s190_s29 = scalar_lea.vmem [#allocation5], %s345_s21 }
  0x1d   : > { %v195_v0 = vld [vmem:[%s194_s8] sm:$0xf]  ;;  %s255_s30 = sshll.u32 %s190_s29, 4  ;;  %s257_s4 = sshll.u32 %s253_s28, 4  ;;  %s256_s30 = int_to_ptr.vmem [resolvable:$true] %s255_s30  ;;  %s258_s4 = int_to_ptr.hbm [resolvable:$true] %s257_s4 }
  0x1e   : > { %201 = vrot.lane.b32.xlu0 %v195_v0, %s539_s9  ;;  %v197_v1 = vrot.slane %v195_v0, 4  ;;  %s242_s5 = scalar_lea.sflag [#allocation4], %s188_s19  ;;  %s468_s6 = sshra.s32 %s258_s4, 4  ;;  %s469_s6 = int_to_ptr.hbm [resolvable:$true] %s468_s6 }
  0x1f   : > { %s470_s15 = scalar_lea.hbm %s469_s6, 8  ;;  %s474_s9 = scalar_lea.hbm %s668_s3, 16 }
  0x20   : > { %p471_p1 = scmp.ne.s32.totalorder %s469_s6, %s470_s15  ;;  %p475_p5 = scmp.lt.s32.totalorder %s469_s6, %s668_s3 }
  0x21   : > { %p476_p6 = scmp.lt.s32.totalorder %s474_s9, %s470_s15 }
  0x22   : > { %p472_p2 = pnand %p471_p1, %p602_p4 }
  0x23   : > { %p477_p7 = por %p476_p6, %p475_p5 }
  0x24   : > { %p473_p3 = pneg %p472_p2 }
  0x26   : > { %198 = vrot.lane.b32.xlu0 %v197_v1, %s540_s10  ;;  %p478_p9 = pnand %p477_p7, %p473_p3 }
  0x8b   : > { %v210_v8 = vpop.permute.xlu1 %209 }
  0x90   : > { %v202_v4 = vpop.permute.xlu0 %201 }
  0x91   : > { %347 = vmatpush.msk.msra.mxu0 %vm203_vm0, %v202_v4 }
  0x98   : > { %v199_v5 = vpop.permute.xlu0 %198 }
  0x99   : > { %v204_v7 = vsel %vm203_vm0, %v195_v0, %v199_v5 }
  0x9a   : > { %233 = vmatpush.msra.mxu0 %v204_v7 }
  0x9b   : > { %348 = vmatmul.msk.f32.vlgmr.msra.gmra.mxu0 %vm212_vm1, %v205_v6 }
 0x118   : > { %v235_v9 = vpop.f32.mrf.mxu0 }
 0x119   : > { %v236_v10 = vadd.f32 %v235_v9, %v210_v8 }
 0x11b   : > { %v238_v11 = vmax.f32 %v236_v10, 0.0 }
 0x11d   : > { %240 = vst.msk [vmem:[%s190_s29] sm:$0xff] %vm239_vm2, %v238_v11 }
 0x11e   : > { %481 = shalt.err (!%p478_p9)
}
 0x11f   : > { %357 = dma.vmem_to_hbm [thread:$0]  (%p602_p4), %s256_s30, 128, %s258_s4, %s242_s5  }
 0x120 PF: > { %p369_p10 = scmp.ge.s32.totalorder %s536_s17, 2  ;;  %s269_s18 = sand.u32 1, %s516_s12  }
 0x121   : > { %s270_s19 = scalar_lea.sflag [#allocation4], %s269_s18 }
 0x122   : > { %p364_p11 = pnand %p369_p10, %p609_p8 }
 0x124   : > { %p365_p12 = pneg %p364_p11 }
 0x126   : > { %511 = dma.done.wait (%p365_p12), %s270_s19, 128  }
 0x127   : > { %513 = vsyncadd (%p365_p12), %s270_s19, 4294967168  ;;  %s17_s17 = sadd.s32 1, %s536_s17   ;;  %s671_s12 = smov %s520_s13 }
 0x128   : > { %p14_p13 = scmp.ge.s32.totalorder %s17_s17, 4   ;;  %s672_s13 = smov %s524_s14 }
 0x129   : > { %s673_s14 = smov %s615_s25  ;;  %s674_s15 = smov %s532_s16 }
 0x12a   : > { %s675_s16 = smov %s677_s20  ;;  %16 = sbr.rel (!%p14_p13) target bundleno = 5 (0x5), region = 72 }
 0x12f   :  { %276 = vsyncpa [#allocation3], 1 }
 0x130   :  { %278 = vsyncpa [#allocation3 + $0x1], 1 }
 0x131   :  { %279 = vsyncpa [#allocation4], 1 }
 0x132   :  { %281 = vsyncpa [#allocation4 + $0x1], 1 }

</bundles_post_ra>
